<compile_context>
chip_gen: v5e
topology: v5e:2x2
jax: 0.10.0
libtpu: 0.0.40
codegen_flags: <defaults>
</compile_context>

<pallas_src>
import math
import functools

import jax
import jax.numpy as jnp
import numpy as np
from jax import lax
from jax.experimental import pallas as pl
from jax.experimental.pallas import tpu as pltpu


# ----------------------------------------------------------------------------
# TPU-generation detection (tile / precision policy only; safe fallback)
# ----------------------------------------------------------------------------
def _device_kind():
    try:
        return jax.devices()[0].device_kind.lower()
    except Exception:
        return ""


_KIND = _device_kind()
_IS_V7 = ("v7" in _KIND) or ("7x" in _KIND)
# bf16 exp only where the EUP has a bf16 path (v6e / v7x); f32 elsewhere.
_EXP_BF16 = ("v6" in _KIND) or _IS_V7
_VMEM_LIMIT = (48 if _IS_V7 else 64) * 1024 * 1024


def _pick_tile(dim, candidates):
    """Largest candidate that evenly divides `dim`, else the full dim."""
    for c in candidates:
        if dim >= c and dim % c == 0:
            return c
    return dim


# ----------------------------------------------------------------------------
# Tiled linear kernel:  y = (x @ Wt + b) * scale
#   x: [M, K] bf16,  Wt: [K, N] bf16 (pre-transposed in the wrapper),  b: [1, N] f32
# ----------------------------------------------------------------------------
def _linear_kernel(x_ref, w_ref, b_ref, o_ref, acc_ref, *, scale):
    @pl.when(pl.program_id(2) == 0)
    def _():
        acc_ref[...] = jnp.zeros_like(acc_ref)

    acc_ref[...] += jnp.dot(
        x_ref[...], w_ref[...], preferred_element_type=jnp.float32
    )

    @pl.when(pl.program_id(2) == pl.num_programs(2) - 1)
    def _():
        o_ref[...] = ((acc_ref[...] + b_ref[...]) * scale).astype(o_ref.dtype)


def pallas_linear(x, w, b, *, scale=1.0, out_dtype=jnp.bfloat16):
    """x: [M, K], w: [N, K] (PyTorch nn.Linear layout), b: [N] -> [M, N]."""
    M, K = x.shape
    N = w.shape[0]

    # Wrapper-side one-time staging: bf16 operands + W pre-transposed to [K, N]
    # so the in-kernel contraction is a plain (tm,tk) @ (tk,tn) MXU feed.
    x_bf = x.astype(jnp.bfloat16)
    wt_bf = jnp.transpose(w).astype(jnp.bfloat16)
    b2 = b.reshape(1, N).astype(jnp.float32)

    tm = _pick_tile(M, (512, 256, 128, 64, 32, 16, 8))
    tn = _pick_tile(N, (512, 256, 128))
    tk = _pick_tile(K, (512, 256, 128))
    grid = (M // tm, N // tn, K // tk)

    kernel = functools.partial(_linear_kernel, scale=scale)
    return pl.pallas_call(
        kernel,
        out_shape=jax.ShapeDtypeStruct((M, N), out_dtype),
        grid=grid,
        in_specs=[
            pl.BlockSpec((tm, tk), lambda i, j, k: (i, k)),
            pl.BlockSpec((tk, tn), lambda i, j, k: (k, j)),
            pl.BlockSpec((1, tn), lambda i, j, k: (0, j)),
        ],
        out_specs=pl.BlockSpec((tm, tn), lambda i, j, k: (i, j)),
        scratch_shapes=[pltpu.VMEM((tm, tn), jnp.float32)],
        compiler_params=pltpu.CompilerParams(
            dimension_semantics=("parallel", "parallel", "arbitrary"),
            vmem_limit_bytes=_VMEM_LIMIT,
        ),
    )(x_bf, wt_bf, b2)


# ----------------------------------------------------------------------------
# Flash-style multi-head attention kernel (head folded into the grid).
#   q, k, v : [B*H, S, dk] bf16 (q already scaled by 1/sqrt(dk))
#   mask    : [MB, MQ, Sk] int8 (0 => masked), MB in {1,B}, MQ in {1,Sq}
#   grid = (B*H, Sq_tiles, Sk_tiles); online softmax over the Sk axis.
# ----------------------------------------------------------------------------
def _mha_kernel(q_ref, k_ref, v_ref, mask_ref, o_ref,
                m_scr, l_scr, acc_scr, *, exp_bf16):
    ki = pl.program_id(2)

    @pl.when(ki == 0)
    def _():
        m_scr[...] = jnp.full_like(m_scr, -jnp.inf)
        l_scr[...] = jnp.zeros_like(l_scr)
        acc_scr[...] = jnp.zeros_like(acc_scr)

    q = q_ref[0]                                   # (tq, dk)  bf16 (pre-scaled)
    k = k_ref[0]                                   # (tkv, dk) bf16
    v = v_ref[0]                                   # (tkv, dk) bf16
    valid = mask_ref[0] != 0                       # (mq_blk, tkv) bool

    # scores = q_scaled @ k^T  (contract last dims)
    s = lax.dot_general(
        q, k, dimension_numbers=(((1,), (1,)), ((), ())),
        preferred_element_type=jnp.float32)        # (tq, tkv) f32
    s = jnp.where(valid, s, -1e30)                 # finite fill: no NaN rows

    m_prev = m_scr[...]                            # (tq, 1)
    m_new = jnp.maximum(m_prev, jnp.max(s, axis=-1, keepdims=True))
    alpha = jnp.exp(m_prev - m_new)                # (tq, 1) f32 (tiny)

    if exp_bf16:                                   # v6e/v7x: bf16 EUP path
        p = jnp.exp((s - m_new).astype(jnp.bfloat16))      # (tq, tkv) bf16
    else:                                          # v5e and older: f32 exp
        p = jnp.exp(s - m_new)                             # (tq, tkv) f32

    l_scr[...] = alpha * l_scr[...] + jnp.sum(
        p, axis=-1, keepdims=True, dtype=jnp.float32)
    pv = jnp.dot(p.astype(v.dtype), v, preferred_element_type=jnp.float32)
    acc_scr[...] = alpha * acc_scr[...] + pv
    m_scr[...] = m_new

    @pl.when(ki == pl.num_programs(2) - 1)
    def _():
        inv_l = pl.reciprocal(l_scr[...], approx=False)    # exact, finalize-only
        o_ref[0] = (acc_scr[...] * inv_l).astype(o_ref.dtype)


def pallas_flash_mha(q, k, v, mask, *, heads):
    """q: [B*H,Sq,dk], k/v: [B*H,Sk,dk] bf16, mask: [MB,MQ,Sk] int8 -> [B*H,Sq,dk]."""
    BH, S_q, dk = q.shape
    S_k = k.shape[1]
    B = BH // heads
    MB, MQ, SK = mask.shape
    assert SK == S_k
    assert MQ in (1, S_q), "mask query dim must be 1 or seq_len_q"
    assert MB in (1, B), "mask batch dim must be 1 or batch"

    if _IS_V7:   # 64 MiB per-TC VMEM: keep attention tiles smaller
        tq_cands = (256, 128, 64, 32, 16, 8)
        tkv_cands = (512, 256, 128)
    else:        # 128 MiB VMEM on v5e/v6e
        tq_cands = (512, 256, 128, 64, 32, 16, 8)
        tkv_cands = (1024, 512, 256, 128)
    tq = _pick_tile(S_q, tq_cands)
    tkv = _pick_tile(S_k, tkv_cands)
    nq, nkv = S_q // tq, S_k // tkv
    mq_blk = tq if MQ > 1 else 1

    def q_idx(bh, qi, ki):
        return (bh, qi, 0)

    def kv_idx(bh, qi, ki):
        return (bh, ki, 0)

    def mask_idx(bh, qi, ki):
        return (bh // heads if MB > 1 else 0, qi if MQ > 1 else 0, ki)

    kernel = functools.partial(_mha_kernel, exp_bf16=_EXP_BF16)
    return pl.pallas_call(
        kernel,
        out_shape=jax.ShapeDtypeStruct((BH, S_q, dk), q.dtype),
        grid=(BH, nq, nkv),
        in_specs=[
            pl.BlockSpec((1, tq, dk), q_idx),
            pl.BlockSpec((1, tkv, dk), kv_idx),
            pl.BlockSpec((1, tkv, dk), kv_idx),
            pl.BlockSpec((1, mq_blk, tkv), mask_idx),
        ],
        out_specs=pl.BlockSpec((1, tq, dk), q_idx),
        scratch_shapes=[
            pltpu.VMEM((tq, 1), jnp.float32),    # running max  m
            pltpu.VMEM((tq, 1), jnp.float32),    # running sum  l
            pltpu.VMEM((tq, dk), jnp.float32),   # output accumulator
        ],
        compiler_params=pltpu.CompilerParams(
            dimension_semantics=("parallel", "parallel", "arbitrary"),
            vmem_limit_bytes=_VMEM_LIMIT,
        ),
    )(q, k, v, mask)


# ----------------------------------------------------------------------------
# Full MultiHeadAttention forward (query/key/value: [seq, batch, d_model])
# ----------------------------------------------------------------------------
def multi_head_attention(params, query, key, value, mask, heads):
    S_q, B, d_model = query.shape
    S_k = key.shape[0]
    assert d_model % heads == 0, "d_model must be divisible by heads"
    d_k = d_model // heads
    scale = 1.0 / math.sqrt(d_k)

    def project(x, w, b, proj_scale):
        s = x.shape[0]
        y = pallas_linear(x.reshape(s * B, d_model), w, b,
                          scale=proj_scale, out_dtype=jnp.bfloat16)
        # [s*B, H*dk] -> [s, B, H, dk] -> one XLA transpose -> [B*H, s, dk]
        y = y.reshape(s, B, heads, d_k)
        return jnp.transpose(y, (1, 2, 0, 3)).reshape(B * heads, s, d_k)

    # softmax scale folded into the q projection epilogue (free)
    q = project(query, params["wq"], params["bq"], scale)  # [B*H, Sq, dk] bf16
    k = project(key, params["wk"], params["bk"], 1.0)      # [B*H, Sk, dk] bf16
    v = project(value, params["wv"], params["bv"], 1.0)    # [B*H, Sk, dk] bf16

    if mask is None:
        mask_i = jnp.ones((1, 1, S_k), jnp.int8)
    else:
        # PyTorch mask layout [mq, Sk, mb] -> tiny int8 [mb, mq, Sk]
        mask_i = jnp.transpose((mask != 0), (2, 0, 1)).astype(jnp.int8)

    ctx = pallas_flash_mha(q, k, v, mask_i, heads=heads)   # [B*H, Sq, dk]
    # TODO(synk): dropout on the attention weights is omitted (eval-mode identity).

    # [B*H, Sq, dk] -> [Sq, B, H, dk] -> [Sq*B, d_model]  (one bf16 XLA transpose)
    x = jnp.transpose(ctx.reshape(B, heads, S_q, d_k), (2, 0, 1, 3))
    x = x.reshape(S_q * B, d_model)
    out = pallas_linear(x, params["wo"], params["bo"], out_dtype=jnp.float32)
    return out.reshape(S_q, B, d_model)


# ----------------------------------------------------------------------------
# Pure-JAX reference (mirrors the PyTorch einsum formulation) for verification
# ----------------------------------------------------------------------------
def reference_mha(params, query, key, value, mask, heads):
    S_q, B, d_model = query.shape
    d_k = d_model // heads
    scale = 1.0 / math.sqrt(d_k)
    hp = jax.lax.Precision.HIGHEST

    def proj(x, w, b):
        y = jnp.einsum("sbe,oe->sbo", x, w, precision=hp) + b
        return y.reshape(*x.shape[:-1], heads, d_k)

    q, k, v = (proj(query, params["wq"], params["bq"]),
               proj(key, params["wk"], params["bk"]),
               proj(value, params["wv"], params["bv"]))
    scores = jnp.einsum("ibhd,jbhd->ijbh", q, k, precision=hp) * scale
    m = mask[:, :, :, None]                          # [mq, Sk, mb, 1]
    scores = jnp.where(m == 0, -jnp.inf, scores)
    attn = jax.nn.softmax(scores, axis=1)
    x = jnp.einsum("ijbh,jbhd->ibhd", attn, v, precision=hp)
    x = x.reshape(S_q, B, d_model)
    return jnp.einsum("sbe,oe->sbo", x, params["wo"], precision=hp) + params["bo"]


def init_params(key, d_model):
    ks = jax.random.split(key, 8)
    sc = 0.02
    return {
        "wq": sc * jax.random.normal(ks[0], (d_model, d_model), jnp.float32),
        "bq": sc * jax.random.normal(ks[1], (d_model,), jnp.float32),
        "wk": sc * jax.random.normal(ks[2], (d_model, d_model), jnp.float32),
        "bk": sc * jax.random.normal(ks[3], (d_model,), jnp.float32),
        "wv": sc * jax.random.normal(ks[4], (d_model, d_model), jnp.float32),
        "bv": sc * jax.random.normal(ks[5], (d_model,), jnp.float32),
        "wo": sc * jax.random.normal(ks[6], (d_model, d_model), jnp.float32),
        "bo": sc * jax.random.normal(ks[7], (d_model,), jnp.float32),
    }


if __name__ == "__main__":
    heads, d_model, seq, batch = 4, 256, 16, 2   # dk = 64 (lane-reasonable demo)

    root = jax.random.PRNGKey(0)
    kp, kq, kk, kv = jax.random.split(root, 4)
    params = init_params(kp, d_model)

    query = jax.random.normal(kq, (seq, batch, d_model), jnp.float32)
    key_in = jax.random.normal(kk, (seq, batch, d_model), jnp.float32)
    value = jax.random.normal(kv, (seq, batch, d_model), jnp.float32)

    # causal mask, PyTorch-module layout [seq_q, seq_k, 1] (broadcast over batch)
    mask = jnp.tril(jnp.ones((seq, seq), jnp.float32))[:, :, None]

    out = multi_head_attention(params, query, key_in, value, mask, heads)
    out = jax.block_until_ready(out)

    ref = reference_mha(params, query, key_in, value, mask, heads)
    np.testing.assert_allclose(np.asarray(out), np.asarray(ref), rtol=3e-2, atol=5e-3)

    print("KERNEL_OK")
</pallas_src>

<mosaic_0001>
module attributes {stable_mosaic.version = 11 : i64} {
  func.func @_linear_kernel(%arg0: i32, %arg1: i32, %arg2: i32, %arg3: memref<32x256xbf16, #tpu.memory_space<vmem>>, %arg4: memref<256x256xbf16, #tpu.memory_space<vmem>>, %arg5: memref<1x256xf32, #tpu.memory_space<vmem>>, %arg6: memref<32x256xbf16, #tpu.memory_space<vmem>>, %arg7: memref<32x256xf32, #tpu.memory_space<vmem>>) attributes {dimension_semantics = [#tpu.dimension_semantics<parallel>, #tpu.dimension_semantics<parallel>, #tpu.dimension_semantics<arbitrary>], iteration_bounds = array<i64: 1, 1, 1>, scalar_prefetch = 0 : i64, scratch_operands = 1 : i64, tpu.core_type = #tpu.core_type<tc>, window_params = [{transform_indices = @transform_0, window_bounds = array<i64: 32, 256>}, {transform_indices = @transform_1, window_bounds = array<i64: 256, 256>}, {transform_indices = @transform_2, window_bounds = array<i64: 1, 256>}, {transform_indices = @transform_3, window_bounds = array<i64: 32, 256>}]} {
    %c0_i32 = arith.constant 0 : i32
    %0 = arith.cmpi eq, %arg2, %c0_i32 : i32
    %1 = arith.extui %0 : i1 to i32
    %c0_i32_0 = arith.constant 0 : i32
    %2 = arith.cmpi ne, %1, %c0_i32_0 : i32
    scf.if %2 {
      %cst_10 = arith.constant 0.000000e+00 : f32
      %12 = vector.broadcast %cst_10 : f32 to vector<32x256xf32>
      %c0_11 = arith.constant 0 : index
      %c0_12 = arith.constant 0 : index
      %13 = vector.load %arg7[%c0_11, %c0_12] : memref<32x256xf32, #tpu.memory_space<vmem>>, vector<32x256xf32>
      tpu.vector_store %arg7[%c0_11, %c0_12], %12 {strides = array<i32>} : memref<32x256xf32, #tpu.memory_space<vmem>>, vector<32x256xf32>,
    } else {
    }
    %c0 = arith.constant 0 : index
    %c0_1 = arith.constant 0 : index
    %3 = vector.load %arg7[%c0, %c0_1] : memref<32x256xf32, #tpu.memory_space<vmem>>, vector<32x256xf32>
    %c0_2 = arith.constant 0 : index
    %c0_3 = arith.constant 0 : index
    %4 = vector.load %arg3[%c0_2, %c0_3] : memref<32x256xbf16, #tpu.memory_space<vmem>>, vector<32x256xbf16>
    %c0_4 = arith.constant 0 : index
    %c0_5 = arith.constant 0 : index
    %5 = vector.load %arg4[%c0_4, %c0_5] : memref<256x256xbf16, #tpu.memory_space<vmem>>, vector<256x256xbf16>
    %cst = arith.constant dense<0.000000e+00> : vector<32x256xf32>
    %6 = tpu.matmul %4, %5, %cst {dimension_numbers = #tpu.dot_dimension_numbers<[1], [0], [0], [1], [0, 0, 1, 1], [], []>} : vector<32x256xbf16>, vector<256x256xbf16>, vector<32x256xf32> -> vector<32x256xf32>
    %7 = arith.addf %3, %6 : vector<32x256xf32>
    %c0_6 = arith.constant 0 : index
    %c0_7 = arith.constant 0 : index
    %8 = vector.load %arg7[%c0_6, %c0_7] : memref<32x256xf32, #tpu.memory_space<vmem>>, vector<32x256xf32>
    tpu.vector_store %arg7[%c0_6, %c0_7], %7 {strides = array<i32>} : memref<32x256xf32, #tpu.memory_space<vmem>>, vector<32x256xf32>,
    %c0_i32_8 = arith.constant 0 : i32
    %9 = arith.cmpi eq, %arg2, %c0_i32_8 : i32
    %10 = arith.extui %9 : i1 to i32
    %c0_i32_9 = arith.constant 0 : i32
    %11 = arith.cmpi ne, %10, %c0_i32_9 : i32
    scf.if %11 {
      %c0_10 = arith.constant 0 : index
      %c0_11 = arith.constant 0 : index
      %12 = vector.load %arg7[%c0_10, %c0_11] : memref<32x256xf32, #tpu.memory_space<vmem>>, vector<32x256xf32>
      %c0_12 = arith.constant 0 : index
      %c0_13 = arith.constant 0 : index
      %13 = vector.load %arg5[%c0_12, %c0_13] : memref<1x256xf32, #tpu.memory_space<vmem>>, vector<1x256xf32>
      %14 = vector.broadcast %13 : vector<1x256xf32> to vector<32x256xf32>
      %15 = arith.addf %12, %14 : vector<32x256xf32>
      %cst_14 = arith.constant 1.250000e-01 : f32
      %16 = vector.broadcast %cst_14 : f32 to vector<32x256xf32>
      %17 = arith.mulf %15, %16 : vector<32x256xf32>
      %18 = arith.truncf %17 : vector<32x256xf32> to vector<32x256xbf16>
      %c0_15 = arith.constant 0 : index
      %c0_16 = arith.constant 0 : index
      %19 = vector.load %arg6[%c0_15, %c0_16] : memref<32x256xbf16, #tpu.memory_space<vmem>>, vector<32x256xbf16>
      tpu.vector_store %arg6[%c0_15, %c0_16], %18 {strides = array<i32>} : memref<32x256xbf16, #tpu.memory_space<vmem>>, vector<32x256xbf16>,
    } else {
    }
    return
  }
  func.func @transform_0(%arg0: i32, %arg1: i32, %arg2: i32) -> (i32, i32) {
    %c0_i32 = arith.constant 0 : i32
    return %arg0, %arg2 : i32, i32
  }
  func.func @transform_1(%arg0: i32, %arg1: i32, %arg2: i32) -> (i32, i32) {
    %c0_i32 = arith.constant 0 : i32
    return %arg2, %arg1 : i32, i32
  }
  func.func @transform_2(%arg0: i32, %arg1: i32, %arg2: i32) -> (i32, i32) {
    %c0_i32 = arith.constant 0 : i32
    %c0_i32_0 = arith.constant 0 : i32
    return %c0_i32, %arg1 : i32, i32
  }
  func.func @transform_3(%arg0: i32, %arg1: i32, %arg2: i32) -> (i32, i32) {
    %c0_i32 = arith.constant 0 : i32
    return %arg0, %arg1 : i32, i32
  }
}

</mosaic_0001>

<bundles_post_ra>
// kernel: tpu_custom_call.1
= control target key start
LH: loop header
LB: loop body
LE: loop exit
PB: predicated region body
PF: predicated region fallthrough
CT: control target
= control target key end

     0   :  { %8 = vsyncpa [#allocation4], 0  ;;  %s784_s0 = inlined_call_operand.hbm [shape: bf16[32,256], index: 0, kind: input, shape index: {}]   ;;  %s785_s1 = inlined_call_operand.hbm [shape: bf16[256,256], index: 1, kind: input, shape index: {}]   ;;  %s786_s2 = inlined_call_operand.hbm [shape: f32[1,256], index: 2, kind: input, shape index: {}]   ;;  %s787_s3 = inlined_call_operand.hbm [shape: bf16[32,256], index: 3, kind: output, shape index: {}]  }
   0x1   :  { %9 = vsyncpa [#allocation7], 0 }
   0x2   :  { %10 = vsyncpa [#allocation5], 0  ;;  %s28_s14 = sshll.u32 %s785_s1, 4  ;;  %s737_s15 = smov [#allocation6]   ;;  %s29_s14 = int_to_ptr.hbm [resolvable:$true] %s28_s14 }
   0x3   :  { %s30_s16 = sshll.u32 %s737_s15, 4  ;;  %s15_s19 = sshll.u32 %s784_s0, 4  ;;  %s31_s16 = int_to_ptr.vmem [resolvable:$true] %s30_s16  ;;  %s16_s19 = int_to_ptr.hbm [resolvable:$true] %s15_s19 }
   0x4   :  { %s738_s20 = smov 128   ;;  %s739_s21 = smov 8  }
   0x5   :  { %36 = dma.hbm_to_vmem [thread:$0]  %s29_s14, 4096, %s31_s16, [#allocation7], %s738_s20, %s738_s20, %s739_s21  }
   0x6   :  { %s740_s22 = smov [#allocation3]   ;;  %s42_s1 = sshll.u32 %s786_s2, 4  ;;  %s43_s1 = int_to_ptr.hbm [resolvable:$true] %s42_s1 }
   0x7   :  { %s17_s23 = sshll.u32 %s740_s22, 4  ;;  %s741_s0 = smov [#allocation8]   ;;  %s18_s23 = int_to_ptr.vmem [resolvable:$true] %s17_s23 }
   0x8   :  { %23 = dma.hbm_to_vmem [thread:$0]  %s16_s19, 512, %s18_s23, [#allocation4], %s738_s20, %s738_s20, %s739_s21  }
   0x9   :  { %s44_s26 = sshll.u32 %s741_s0, 4  ;;  %s45_s26 = int_to_ptr.vmem [resolvable:$true] %s44_s26 }
   0xa   :  { %47 = dma.hbm_to_vmem [thread:$0]  %s43_s1, 32, %s45_s26, [#allocation7]  }
   0xb   :  { %731 = dma.done.wait [#allocation4], 512  }
   0xc   :  { %732 = vsyncadd [#allocation4], 4294966784 }
   0xd   :  { %733 = dma.done.wait [#allocation7], 4128  }
   0xe   :  { %734 = vsyncadd [#allocation7], 4294963168  ;;  %v523_v0 = vld [vmem:[#allocation6 + $0x70] sm:$0xf]  ;;  %v612_v1 = vld [vmem:[#allocation6 + $0x74] sm:$0xf0] }
   0xf   :  { %v587_v2 = vld [vmem:[#allocation6 + $0xf0] sm:$0xf]  ;;  %v524_v3 = vor.u32 %v612_v1, %v523_v0  ;;  %v628_v4 = vld [vmem:[#allocation6 + $0xf4] sm:$0xf0]  ;;  %v611_v5 = vld [vmem:[#allocation6 + $0x74] sm:$0xf] }
  0x10   :  { %v525_v6 = vld [vmem:[#allocation6 + $0x78] sm:$0xf0]  ;;  %v588_v7 = vor.u32 %v628_v4, %v587_v2  ;;  %v627_v9 = vld [vmem:[#allocation6 + $0xf4] sm:$0xf]  ;;  %v515_v11 = vld [vmem:[#allocation6 + $0x60] sm:$0xf] }
  0x11   :  { %v528_v8 = vor.u32 %v611_v5, %v525_v6  ;;  %v589_v10 = vld [vmem:[#allocation6 + $0xf8] sm:$0xf0]  ;;  %296 = vmatpush.bf16.msra.mxu0 %v524_v3  ;;  %v610_v13 = vld [vmem:[#allocation6 + $0x64] sm:$0xf0]  ;;  %v579_v14 = vld [vmem:[#allocation6 + $0xe0] sm:$0xf] }
  0x12   :  { %v592_v12 = vor.u32 %v627_v9, %v589_v10  ;;  %v626_v15 = vld [vmem:[#allocation6 + $0xe4] sm:$0xf0]  ;;  %315 = vmatpush.bf16.msra.mxu1 %v588_v7  ;;  %v516_v16 = vor.u32 %v610_v13, %v515_v11  ;;  %v609_v18 = vld [vmem:[#allocation6 + $0x64] sm:$0xf]  ;;  %v517_v19 = vld [vmem:[#allocation6 + $0x68] sm:$0xf0] }
  0x13   :  { %334 = vmatpush.bf16.msra.mxu2 %v528_v8  ;;  %v580_v17 = vor.u32 %v626_v15, %v579_v14  ;;  %v625_v20 = vld [vmem:[#allocation6 + $0xe4] sm:$0xf]  ;;  %v520_v21 = vor.u32 %v609_v18, %v517_v19  ;;  %v581_v22 = vld [vmem:[#allocation6 + $0xe8] sm:$0xf0]  ;;  %v507_v23 = vld [vmem:[#allocation6 + $0x50] sm:$0xf] }
  0x14   :  { %353 = vmatpush.bf16.msra.mxu3 %v592_v12  ;;  %v608_v24 = vld [vmem:[#allocation6 + $0x54] sm:$0xf0]  ;;  %v584_v25 = vor.u32 %v625_v20, %v581_v22  ;;  %v571_v26 = vld [vmem:[#allocation6 + $0xd0] sm:$0xf]  ;;  %v607_v28 = vld [vmem:[#allocation6 + $0x54] sm:$0xf] }
  0x15   :  { %v624_v27 = vld [vmem:[#allocation6 + $0xd4] sm:$0xf0]  ;;  %297 = vmatpush.bf16.msra.mxu0 %v516_v16  ;;  %v508_v29 = vor.u32 %v608_v24, %v507_v23  ;;  %v509_v30 = vld [vmem:[#allocation6 + $0x58] sm:$0xf0]  ;;  %v623_v31 = vld [vmem:[#allocation6 + $0xd4] sm:$0xf] }
  0x16   :  { %v573_v32 = vld [vmem:[#allocation6 + $0xd8] sm:$0xf0]  ;;  %316 = vmatpush.bf16.msra.mxu1 %v580_v17  ;;  %v572_v33 = vor.u32 %v624_v27, %v571_v26  ;;  %v512_v34 = vor.u32 %v607_v28, %v509_v30  ;;  %v499_v35 = vld [vmem:[#allocation6 + $0x40] sm:$0xf]  ;;  %v606_v36 = vld [vmem:[#allocation6 + $0x44] sm:$0xf0] }
  0x17   :  { %335 = vmatpush.bf16.msra.mxu2 %v520_v21  ;;  %v563_v37 = vld [vmem:[#allocation6 + $0xc0] sm:$0xf]  ;;  %v576_v38 = vor.u32 %v623_v31, %v573_v32  ;;  %v622_v39 = vld [vmem:[#allocation6 + $0xc4] sm:$0xf0]  ;;  %v605_v40 = vld [vmem:[#allocation6 + $0x44] sm:$0xf]  ;;  %v500_v44 = vor.u32 %v606_v36, %v499_v35 }
  0x18   :  { %354 = vmatpush.bf16.msra.mxu3 %v584_v25  ;;  %v501_v41 = vld [vmem:[#allocation6 + $0x48] sm:$0xf0]  ;;  %v621_v42 = vld [vmem:[#allocation6 + $0xc4] sm:$0xf]  ;;  %v564_v45 = vor.u32 %v622_v39, %v563_v37  ;;  %v491_v47 = vld [vmem:[#allocation6 + $0x30] sm:$0xf] }
  0x19   :  { %v565_v43 = vld [vmem:[#allocation6 + $0xc8] sm:$0xf0]  ;;  %298 = vmatpush.bf16.msra.mxu0 %v508_v29  ;;  %v504_v46 = vor.u32 %v605_v40, %v501_v41  ;;  %v604_v48 = vld [vmem:[#allocation6 + $0x34] sm:$0xf0]  ;;  %v555_v49 = vld [vmem:[#allocation6 + $0xb0] sm:$0xf] }
  0x1a   :  { %317 = vmatpush.bf16.msra.mxu1 %v572_v33  ;;  %v568_v50 = vor.u32 %v621_v42, %v565_v43  ;;  %v620_v51 = vld [vmem:[#allocation6 + $0xb4] sm:$0xf0]  ;;  %v603_v52 = vld [vmem:[#allocation6 + $0x34] sm:$0xf]  ;;  %v493_v53 = vld [vmem:[#allocation6 + $0x38] sm:$0xf0]  ;;  %v492_v56 = vor.u32 %v604_v48, %v491_v47 }
  0x1b   :  { %336 = vmatpush.bf16.msra.mxu2 %v512_v34  ;;  %v619_v54 = vld [vmem:[#allocation6 + $0xb4] sm:$0xf]  ;;  %v557_v55 = vld [vmem:[#allocation6 + $0xb8] sm:$0xf0]  ;;  %v556_v57 = vor.u32 %v620_v51, %v555_v49  ;;  %v496_v58 = vor.u32 %v603_v52, %v493_v53  ;;  %v483_v59 = vld [vmem:[#allocation6 + $0x20] sm:$0xf] }
  0x1c   :  { %355 = vmatpush.bf16.msra.mxu3 %v576_v38  ;;  %v602_v60 = vld [vmem:[#allocation6 + $0x24] sm:$0xf0]  ;;  %v547_v61 = vld [vmem:[#allocation6 + $0xa0] sm:$0xf]  ;;  %v560_v62 = vor.u32 %v619_v54, %v557_v55  ;;  %v601_v0 = vld [vmem:[#allocation6 + $0x24] sm:$0xf] }
  0x1d   :  { %299 = vmatpush.bf16.msra.mxu0 %v500_v44  ;;  %v618_v63 = vld [vmem:[#allocation6 + $0xa4] sm:$0xf0]  ;;  %v485_v1 = vld [vmem:[#allocation6 + $0x28] sm:$0xf0]  ;;  %v617_v2 = vld [vmem:[#allocation6 + $0xa4] sm:$0xf]  ;;  %v484_v4 = vor.u32 %v602_v60, %v483_v59 }
  0x1e   :  { %318 = vmatpush.bf16.msra.mxu1 %v564_v45  ;;  %v549_v3 = vld [vmem:[#allocation6 + $0xa8] sm:$0xf0]  ;;  %v548_v5 = vor.u32 %v618_v63, %v547_v61  ;;  %v488_v6 = vor.u32 %v601_v0, %v485_v1  ;;  %v475_v7 = vld [vmem:[#allocation6 + $0x10] sm:$0xf]  ;;  %v600_v8 = vld [vmem:[#allocation6 + $0x14] sm:$0xf0] }
  0x1f   :  { %337 = vmatpush.bf16.msra.mxu2 %v504_v46  ;;  %v539_v9 = vld [vmem:[#allocation6 + $0x90] sm:$0xf]  ;;  %v552_v10 = vor.u32 %v617_v2, %v549_v3  ;;  %v616_v11 = vld [vmem:[#allocation6 + $0x94] sm:$0xf0]  ;;  %v599_v12 = vld [vmem:[#allocation6 + $0x14] sm:$0xf]  ;;  %v476_v16 = vor.u32 %v600_v8, %v475_v7 }
  0x20   :  { %356 = vmatpush.bf16.msra.mxu3 %v568_v50  ;;  %v477_v13 = vld [vmem:[#allocation6 + $0x18] sm:$0xf0]  ;;  %v615_v14 = vld [vmem:[#allocation6 + $0x94] sm:$0xf]  ;;  %v540_v17 = vor.u32 %v616_v11, %v539_v9  ;;  %v467_v19 = vld [vmem:[#allocation6] sm:$0xf] }
  0x21   :  { %300 = vmatpush.bf16.msra.mxu0 %v492_v56  ;;  %v541_v15 = vld [vmem:[#allocation6 + $0x98] sm:$0xf0]  ;;  %v480_v18 = vor.u32 %v599_v12, %v477_v13  ;;  %v598_v20 = vld [vmem:[#allocation6 + $0x4] sm:$0xf0]  ;;  %v531_v21 = vld [vmem:[#allocation6 + $0x80] sm:$0xf] }
  0x22   :  { %319 = vmatpush.bf16.msra.mxu1 %v556_v57  ;;  %v544_v22 = vor.u32 %v615_v14, %v541_v15  ;;  %v614_v23 = vld [vmem:[#allocation6 + $0x84] sm:$0xf0]  ;;  %v597_v24 = vld [vmem:[#allocation6 + $0x4] sm:$0xf]  ;;  %v469_v25 = vld [vmem:[#allocation6 + $0x8] sm:$0xf0]  ;;  %v468_v28 = vor.u32 %v598_v20, %v467_v19 }
  0x23   :  { %338 = vmatpush.bf16.msra.mxu2 %v496_v58  ;;  %v613_v26 = vld [vmem:[#allocation6 + $0x84] sm:$0xf]  ;;  %v533_v27 = vld [vmem:[#allocation6 + $0x88] sm:$0xf0]  ;;  %v451_v29 = vld [vmem:[#allocation3] sm:$0xf]  ;;  %v532_v31 = vor.u32 %v614_v23, %v531_v21  ;;  %v472_v32 = vor.u32 %v597_v24, %v469_v25 }
  0x24   :  { %357 = vmatpush.bf16.msra.mxu3 %v560_v62  ;;  %v594_v30 = vld [vmem:[#allocation3 + $0x4] sm:$0xf0]  ;;  %v593_v33 = vld [vmem:[#allocation3 + $0x4] sm:$0xf]  ;;  %v453_v34 = vld [vmem:[#allocation3 + $0x8] sm:$0xf0]  ;;  %v536_v35 = vor.u32 %v613_v26, %v533_v27 }
  0x25   :  { %301 = vmatpush.bf16.msra.mxu0 %v484_v4  ;;  %v452_v36 = vor.u32 %v594_v30, %v451_v29  ;;  %v456_v37 = vor.u32 %v593_v33, %v453_v34  ;;  %v459_v38 = vld [vmem:[#allocation3 + $0x10] sm:$0xf]  ;;  %v596_v39 = vld [vmem:[#allocation3 + $0x14] sm:$0xf0]  ;;  %v595_v40 = vld [vmem:[#allocation3 + $0x14] sm:$0xf] }
  0x26   :  { %320 = vmatpush.bf16.msra.mxu1 %v548_v5  ;;  %v461_v41 = vld [vmem:[#allocation3 + $0x18] sm:$0xf0]  ;;  %v460_v42 = vor.u32 %v596_v39, %v459_v38  ;;  %v399_v45 = vld [vmem:[#allocation8] sm:$0x3]  ;;  %s742_s2 = smov [#allocation9]   ;;  %s435_s30 = sshll.u32 %s787_s3, 4  ;;  %s436_s30 = int_to_ptr.hbm [resolvable:$true] %s435_s30 }
  0x27   :  { %339 = vmatpush.bf16.msra.mxu2 %v488_v6  ;;  %v464_v43 = vor.u32 %v595_v40, %v461_v41  ;;  %v401_v48 = vperm.slane %v399_v45, 0  ;;  %v402_v51 = vperm.slane %v399_v45, 1  ;;  %s433_s27 = sshll.u32 %s742_s2, 4  ;;  %s434_s27 = int_to_ptr.vmem [resolvable:$true] %s433_s27 }
  0x28   :  { %358 = vmatpush.bf16.msra.mxu3 %v552_v10 }
  0x29   :  { %302 = vmatpush.bf16.msra.mxu0 %v476_v16 }
  0x2a   :  { %321 = vmatpush.bf16.msra.mxu1 %v540_v17 }
  0x2b   :  { %340 = vmatpush.bf16.msra.mxu2 %v480_v18 }
  0x2c   :  { %359 = vmatpush.bf16.msra.mxu3 %v544_v22 }
  0x2d   :  { %303 = vmatpush.bf16.msra.mxu0 %v468_v28 }
  0x2e   :  { %322 = vmatpush.bf16.msra.mxu1 %v532_v31 }
  0x2f   :  { %341 = vmatpush.bf16.msra.mxu2 %v472_v32 }
  0x30   :  { %360 = vmatpush.bf16.msra.mxu3 %v536_v35  ;;  %304 = vmatmul.bf16.vlgmr.msra.gmra.mxu0 %v452_v36 }
  0x31   :  { %323 = vmatmul.bf16.vlgmr.msra.gmra.mxu1 %v456_v37 }
  0x32   :  { %342 = vmatmul.bf16.vlgmr.msra.gmra.mxu2 %v452_v36 }
  0x33   :  { %361 = vmatmul.bf16.vlgmr.msra.gmra.mxu3 %v456_v37 }
  0x40   :  { %309 = vmatmul.bf16.gmra.mxu0 %v460_v42 }
  0x41   :  { %328 = vmatmul.bf16.gmra.mxu1 %v464_v43 }
  0x42   :  { %347 = vmatmul.bf16.gmra.mxu2 %v460_v42 }
  0x43   :  { %366 = vmatmul.bf16.gmra.mxu3 %v464_v43 }
  0xad   :  { %v305_v44 = vpop.f32.mrf.mxu0 }
  0xae   :  { %v324_v46 = vpop.f32.mrf.mxu1 }
  0xaf   :  { %v325_v47 = vadd.f32 %v324_v46, %v305_v44 }
  0xb1   :  { %v405_v49 = vadd.f32 %v401_v48, %v325_v47 }
  0xb3   :  { %v413_v56 = vmul.f32 0.125, %v405_v49 }
  0xb5   :  { %v343_v50 = vpop.f32.mrf.mxu2  ;;  %v307_v53 = vpop.f32.mrf.mxu0 }
  0xb6   :  { %v362_v52 = vpop.f32.mrf.mxu3  ;;  %v326_v55 = vpop.f32.mrf.mxu1 }
  0xb7   :  { %v363_v54 = vadd.f32 %v362_v52, %v343_v50  ;;  %v327_v59 = vadd.f32 %v326_v55, %v307_v53 }
  0xb9   :  { %v406_v57 = vadd.f32 %v402_v51, %v363_v54  ;;  %v407_v0 = vadd.f32 %v401_v48, %v327_v59 }
  0xbb   :  { %v414_v58 = vmul.f32 0.125, %v406_v57  ;;  %v415_v5 = vmul.f32 0.125, %v407_v0 }
  0xbd   :  { %v421_v60 = vpack.c.bf16 %v414_v58, %v413_v56  ;;  %v345_v61 = vpop.f32.mrf.mxu2  ;;  %v310_v63 = vpop.f32.mrf.mxu0 }
  0xbe   :  { %v364_v62 = vpop.f32.mrf.mxu3  ;;  %v329_v2 = vpop.f32.mrf.mxu1 }
  0xbf   :  { %425 = vst [vmem:[#allocation9] sm:$0xff] %v421_v60  ;;  %v365_v1 = vadd.f32 %v364_v62, %v345_v61  ;;  %v330_v4 = vadd.f32 %v329_v2, %v310_v63 }
  0xc1   :  { %v408_v3 = vadd.f32 %v402_v51, %v365_v1  ;;  %v409_v8 = vadd.f32 %v401_v48, %v330_v4 }
  0xc3   :  { %v416_v6 = vmul.f32 0.125, %v408_v3  ;;  %v417_v14 = vmul.f32 0.125, %v409_v8 }
  0xc5   :  { %v422_v7 = vpack.c.bf16 %v416_v6, %v415_v5  ;;  %v348_v9 = vpop.f32.mrf.mxu2  ;;  %v312_v12 = vpop.f32.mrf.mxu0 }
  0xc6   :  { %v367_v10 = vpop.f32.mrf.mxu3  ;;  %v331_v13 = vpop.f32.mrf.mxu1 }
  0xc7   :  { %426 = vst [vmem:[#allocation9 + $0x8] sm:$0xff] %v422_v7  ;;  %v368_v11 = vadd.f32 %v367_v10, %v348_v9  ;;  %v332_v17 = vadd.f32 %v331_v13, %v312_v12 }
  0xc9   :  { %v410_v15 = vadd.f32 %v402_v51, %v368_v11  ;;  %v411_v21 = vadd.f32 %v401_v48, %v332_v17 }
  0xcb   :  { %v418_v16 = vmul.f32 0.125, %v410_v15  ;;  %v419_v24 = vmul.f32 0.125, %v411_v21 }
  0xcd   :  { %v423_v18 = vpack.c.bf16 %v418_v16, %v417_v14  ;;  %v350_v19 = vpop.f32.mrf.mxu2 }
  0xce   :  { %v369_v20 = vpop.f32.mrf.mxu3 }
  0xcf   :  { %427 = vst [vmem:[#allocation9 + $0x10] sm:$0xff] %v423_v18  ;;  %v370_v22 = vadd.f32 %v369_v20, %v350_v19 }
  0xd1   :  { %v412_v23 = vadd.f32 %v402_v51, %v370_v22 }
  0xd3   :  { %v420_v25 = vmul.f32 0.125, %v412_v23 }
  0xd5   :  { %v424_v26 = vpack.c.bf16 %v420_v25, %v419_v24 }
  0xd7   :  { %428 = vst [vmem:[#allocation9 + $0x18] sm:$0xff] %v424_v26 }
  0xd8   :  { %441 = dma.vmem_to_hbm [thread:$0]  %s434_s27, 512, %s436_s30, [#allocation5], %s738_s20, %s738_s20, %s739_s21  }
  0xd9   :  { %735 = dma.done.wait [#allocation5], 512  }
  0xda   :  { %736 = vsyncadd [#allocation5], 4294966784 }
  0xdb   :  { %446 = vsyncpa [#allocation4], 1 }
  0xdc   :  { %447 = vsyncpa [#allocation7], 1 }
  0xdd   :  { %448 = vsyncpa [#allocation5], 1 }

</bundles_post_ra>
